<compile_context>
chip_gen: v7x
topology: tpu7x:2x2x1
jax: 0.10.0
libtpu: 0.0.40
codegen_flags: <defaults>
</compile_context>

<pallas_src>
import jax
import jax.numpy as jnp
from jax import lax
from jax.experimental import pallas as pl
from jax.experimental.pallas import tpu as pltpu

# Shapes implied by the module: Conv2d(3, 8, 3, stride=1, padding=1).
H = 16
W = 16
HW = H * W                 # 256 -> lane-dense (multiple of 128)
CIN = 3
CIN_PAD = 8                # pad input channels to one full sublane slab
COUT = 8
K = 3
TAPS = K * K               # 9
MAX_IMAGES_PER_STEP = 16   # lane block <= 16*256 = 4096; VMEM stays tiny on all gens


def _fused_model_kernel(x_ref, w_ref, b_ref, mask_ref, o_ref):
    """Fused forward for B images packed on the lane axis.

    x_ref    : (CIN_PAD, L)            L = B*HW; channels 3..7 are zero
    w_ref    : (3*COUT, TAPS*CIN_PAD)  stacked [conv1; conv2; conv4],
                                       column index = (kh*3 + kw)*8 + ci
    b_ref    : (3*COUT, 1)             stacked biases
    mask_ref : (TAPS*CIN_PAD, L)       1.0 where a tap's source pixel is valid
                                       (row t*8+ci is tap t's mask, tiled per image)
    o_ref    : (COUT, L)               v5 = v3 + v4
    """
    x = x_ref[...]                      # (8, L) f32
    mask = mask_ref[...]                # (72, L) f32
    L = x.shape[1]                      # static

    def conv3x3(a, idx):
        # Nine lane-rolled copies of the 8-channel activation -> (72, L) im2col.
        # Each slab is exactly one 8-sublane vreg footprint, so the concat is
        # pure vreg placement.  Cross-image / out-of-bounds lanes are zeroed
        # by the mask (single aligned VPU multiply).
        slabs = []
        for kh in range(K):
            for kw in range(K):
                delta = (kh - 1) * W + (kw - 1)      # lane offset of this tap
                if delta == 0:
                    slabs.append(a)
                else:
                    slabs.append(pltpu.roll(a, shift=(-delta) % L, axis=1))
        im2col = jnp.concatenate(slabs, axis=0) * mask        # (72, L)
        wmat = w_ref[idx * COUT:(idx + 1) * COUT, :]          # (8, 72)
        bias = b_ref[idx * COUT:(idx + 1) * COUT, :]          # (8, 1)
        out = jnp.dot(wmat, im2col, preferred_element_type=jnp.float32)
        return out + bias                                     # (8, L)

    v1 = conv3x3(x, 0)          # conv1(x)
    # Padded weight columns (ci=3..7) are zero, so the full 8-channel add
    # is equivalent to the documented x + v1[:, :3] interpretation.
    a = x + v1
    # NOTE: v2 = conv3(x + v1) is dead in the reference (never used) -> dropped.
    v3 = conv3x3(a, 1)          # conv2(x + v1)   (conv2 synthesized)
    bsum = x + v3
    v4 = conv3x3(bsum, 2)       # conv4(x + v3)
    o_ref[...] = v3 + v4        # v5


def _images_per_step(n):
    """Images packed on lanes per grid step; keep >= 2 grid steps when N >= 2."""
    if n <= 1:
        return 1
    return int(min(MAX_IMAGES_PER_STEP, pl.cdiv(n, 2)))


def _build_mask(images_per_step):
    """(72, B*HW) per-tap validity mask (implicit 'same' padding), tiled per image."""
    hh = jnp.arange(H).reshape(H, 1)
    ww = jnp.arange(W).reshape(1, W)
    rows = []
    for kh in range(K):
        for kw in range(K):
            dh, dw = kh - 1, kw - 1
            valid = ((hh + dh >= 0) & (hh + dh < H) &
                     (ww + dw >= 0) & (ww + dw < W))
            rows.append(valid.reshape(HW))
    m = jnp.stack(rows, axis=0).astype(jnp.float32)       # (9, HW)
    m = jnp.tile(m, (1, images_per_step))                 # (9, B*HW) per-image tiling
    m = jnp.repeat(m, CIN_PAD, axis=0)                    # (72, B*HW) one row per im2col row
    return m


def model_forward(x_nchw, w_stack, b_stack):
    """x_nchw: (N, 3, 16, 16) f32 -> (N, 8, 16, 16) f32 (NCHW, like the module)."""
    N = x_nchw.shape[0]
    B = _images_per_step(N)                # images per grid step (on lanes)
    G = int(pl.cdiv(N, B))                 # grid steps
    n_pad = G * B
    L = B * HW

    x = x_nchw.reshape(N, CIN, HW)
    if n_pad != N:
        x = jnp.concatenate(
            [x, jnp.zeros((n_pad - N, CIN, HW), x.dtype)], axis=0)
    # Pad channels 3 -> 8 (zero channels; matching weight columns are zero).
    x = jnp.concatenate(
        [x, jnp.zeros((n_pad, CIN_PAD - CIN, HW), x.dtype)], axis=1)
    # (n_pad, 8, HW) -> (G, 8, B*HW): B images concatenated on the lane axis.
    x = x.reshape(G, B, CIN_PAD, HW).transpose(0, 2, 1, 3).reshape(G, CIN_PAD, L)

    mask = _build_mask(B)                  # (72, L) constant, fetched once

    out = pl.pallas_call(
        _fused_model_kernel,
        out_shape=jax.ShapeDtypeStruct((G, COUT, L), jnp.float32),
        grid=(G,),
        in_specs=[
            pl.BlockSpec((None, CIN_PAD, L), lambda g: (g, 0, 0)),
            pl.BlockSpec((3 * COUT, TAPS * CIN_PAD), lambda g: (0, 0)),
            pl.BlockSpec((3 * COUT, 1), lambda g: (0, 0)),
            pl.BlockSpec((TAPS * CIN_PAD, L), lambda g: (0, 0)),
        ],
        out_specs=pl.BlockSpec((None, COUT, L), lambda g: (g, 0, 0)),
        compiler_params=pltpu.CompilerParams(
            dimension_semantics=("parallel",)),   # v7x: grid steps split across TCs
    )(x, w_stack, b_stack, mask)

    out = (out.reshape(G, COUT, B, HW)
              .transpose(0, 2, 1, 3)
              .reshape(n_pad, COUT, H, W))
    return out[:N]


def pack_params(convs):
    """convs: list of (w (Cout,3,3,3) OIHW, b (Cout,)) -> (24, 72), (24, 1).

    Column index = (kh*3 + kw)*CIN_PAD + ci, matching the kernel's im2col rows;
    columns for ci in [3, 8) are zero-padded.
    """
    ws, bs = [], []
    for w_oihw, b in convs:
        w = jnp.transpose(w_oihw, (0, 2, 3, 1))                      # (Cout,KH,KW,Cin)
        w = jnp.pad(w, ((0, 0), (0, 0), (0, 0), (0, CIN_PAD - CIN)))  # pad Cin -> 8
        ws.append(w.reshape(COUT, TAPS * CIN_PAD))
        bs.append(b.reshape(COUT, 1))
    return jnp.concatenate(ws, axis=0), jnp.concatenate(bs, axis=0)


# ---- Pure-JAX reference of the same (documented) interpretation -------------
def _conv_ref(x, w, b):
    y = lax.conv_general_dilated(
        x, w, window_strides=(1, 1), padding=((1, 1), (1, 1)),
        dimension_numbers=("NCHW", "OIHW", "NCHW"))
    return y + b[None, :, None, None]


def model_ref(x, params):
    (w1, b1), (w2, b2), (w4, b4) = params
    v1 = _conv_ref(x, w1, b1)
    a = x + v1[:, :CIN]
    v3 = _conv_ref(a, w2, b2)
    bsum = x + v3[:, :CIN]
    v4 = _conv_ref(bsum, w4, b4)
    return v3 + v4


if __name__ == "__main__":
    root = jax.random.PRNGKey(0)
    kx, k1, k2, k4, kx2 = jax.random.split(root, 5)

    def init_conv(key):
        kw_, kb_ = jax.random.split(key)
        w = jax.random.normal(kw_, (COUT, CIN, K, K), jnp.float32) * 0.1
        b = jax.random.normal(kb_, (COUT,), jnp.float32) * 0.1
        return w, b

    params = (init_conv(k1),   # conv1
              init_conv(k2),   # conv2 (synthesized, see TODO above)
              init_conv(k4))   # conv4
    w_stack, b_stack = pack_params(params)

    fwd = jax.jit(model_forward)

    # Primary test: N=2 (B=1, grid=2 -> one image per TC on v7x).
    x = jax.random.normal(kx, (2, CIN, H, W), jnp.float32)
    out = fwd(x, w_stack, b_stack)
    jax.block_until_ready(out)
    ref = model_ref(x, params)
    err = float(jnp.max(jnp.abs(out - ref)))
    assert out.shape == (2, COUT, H, W)
    assert out.dtype == jnp.float32
    assert err < 1e-3, f"N=2 max abs err vs reference: {err}"

    # Secondary test: N=5 exercises batch-fused-into-lanes (B=3, grid=2) + padding.
    x5 = jax.random.normal(kx2, (5, CIN, H, W), jnp.float32)
    out5 = fwd(x5, w_stack, b_stack)
    jax.block_until_ready(out5)
    ref5 = model_ref(x5, params)
    err5 = float(jnp.max(jnp.abs(out5 - ref5)))
    assert out5.shape == (5, COUT, H, W)
    assert err5 < 1e-3, f"N=5 max abs err vs reference: {err5}"

    print("KERNEL_OK")
</pallas_src>

<mosaic_0001>
module attributes {stable_mosaic.version = 11 : i64} {
  func.func @_fused_model_kernel(%arg0: i32, %arg1: memref<1x8x256xf32, #tpu.memory_space<vmem>>, %arg2: memref<24x72xf32, #tpu.memory_space<vmem>>, %arg3: memref<24x1xf32, #tpu.memory_space<vmem>>, %arg4: memref<72x256xf32, #tpu.memory_space<vmem>>, %arg5: memref<1x8x256xf32, #tpu.memory_space<vmem>>) attributes {dimension_semantics = [#tpu.dimension_semantics<parallel>], iteration_bounds = array<i64: 2>, scalar_prefetch = 0 : i64, scratch_operands = 0 : i64, tpu.core_type = #tpu.core_type<tc>, window_params = [{transform_indices = @transform_0, window_bounds = array<i64: 1, 8, 256>}, {pipeline_mode = #tpu.pipeline_mode<synchronous>, transform_indices = @transform_1, window_bounds = array<i64: 24, 72>}, {pipeline_mode = #tpu.pipeline_mode<synchronous>, transform_indices = @transform_2, window_bounds = array<i64: 24, 1>}, {pipeline_mode = #tpu.pipeline_mode<synchronous>, transform_indices = @transform_3, window_bounds = array<i64: 72, 256>}, {transform_indices = @transform_4, window_bounds = array<i64: 1, 8, 256>}]} {
    %c0 = arith.constant 0 : index
    %c0_0 = arith.constant 0 : index
    %c0_1 = arith.constant 0 : index
    %0 = vector.load %arg1[%c0, %c0_0, %c0_1] : memref<1x8x256xf32, #tpu.memory_space<vmem>>, vector<1x8x256xf32>
    %1 = vector.shape_cast %0 : vector<1x8x256xf32> to vector<8x256xf32>
    %c0_2 = arith.constant 0 : index
    %c0_3 = arith.constant 0 : index
    %2 = vector.load %arg4[%c0_2, %c0_3] : memref<72x256xf32, #tpu.memory_space<vmem>>, vector<72x256xf32>
    %c17_i32 = arith.constant 17 : i32
    %3 = tpu.dynamic_rotate %1 by %c17_i32 dim 1 : vector<8x256xf32>, i32 -> vector<8x256xf32>
    %c16_i32 = arith.constant 16 : i32
    %4 = tpu.dynamic_rotate %1 by %c16_i32 dim 1 : vector<8x256xf32>, i32 -> vector<8x256xf32>
    %c15_i32 = arith.constant 15 : i32
    %5 = tpu.dynamic_rotate %1 by %c15_i32 dim 1 : vector<8x256xf32>, i32 -> vector<8x256xf32>
    %c1_i32 = arith.constant 1 : i32
    %6 = tpu.dynamic_rotate %1 by %c1_i32 dim 1 : vector<8x256xf32>, i32 -> vector<8x256xf32>
    %c255_i32 = arith.constant 255 : i32
    %7 = tpu.dynamic_rotate %1 by %c255_i32 dim 1 : vector<8x256xf32>, i32 -> vector<8x256xf32>
    %c241_i32 = arith.constant 241 : i32
    %8 = tpu.dynamic_rotate %1 by %c241_i32 dim 1 : vector<8x256xf32>, i32 -> vector<8x256xf32>
    %c240_i32 = arith.constant 240 : i32
    %9 = tpu.dynamic_rotate %1 by %c240_i32 dim 1 : vector<8x256xf32>, i32 -> vector<8x256xf32>
    %c239_i32 = arith.constant 239 : i32
    %10 = tpu.dynamic_rotate %1 by %c239_i32 dim 1 : vector<8x256xf32>, i32 -> vector<8x256xf32>
    %11 = tpu.concatenate %3, %4, %5, %6, %1, %7, %8, %9, %10 in 0 : vector<8x256xf32>, vector<8x256xf32>, vector<8x256xf32>, vector<8x256xf32>, vector<8x256xf32>, vector<8x256xf32>, vector<8x256xf32>, vector<8x256xf32>, vector<8x256xf32> -> vector<72x256xf32>
    %12 = arith.mulf %11, %2 : vector<72x256xf32>
    %c0_4 = arith.constant 0 : index
    %c0_5 = arith.constant 0 : index
    %13 = vector.load %arg2[%c0_4, %c0_5] : memref<24x72xf32, #tpu.memory_space<vmem>>, vector<8x72xf32>
    %c0_6 = arith.constant 0 : index
    %c0_7 = arith.constant 0 : index
    %14 = vector.load %arg3[%c0_6, %c0_7] : memref<24x1xf32, #tpu.memory_space<vmem>>, vector<8x1xf32>
    %cst = arith.constant dense<0.000000e+00> : vector<8x256xf32>
    %15 = tpu.matmul %13, %12, %cst {dimension_numbers = #tpu.dot_dimension_numbers<[1], [0], [0], [1], [0, 0, 1, 1], [], []>} : vector<8x72xf32>, vector<72x256xf32>, vector<8x256xf32> -> vector<8x256xf32>
    %16 = vector.broadcast %14 : vector<8x1xf32> to vector<8x256xf32>
    %17 = arith.addf %15, %16 : vector<8x256xf32>
    %18 = arith.addf %1, %17 : vector<8x256xf32>
    %c17_i32_8 = arith.constant 17 : i32
    %19 = tpu.dynamic_rotate %18 by %c17_i32_8 dim 1 : vector<8x256xf32>, i32 -> vector<8x256xf32>
    %c16_i32_9 = arith.constant 16 : i32
    %20 = tpu.dynamic_rotate %18 by %c16_i32_9 dim 1 : vector<8x256xf32>, i32 -> vector<8x256xf32>
    %c15_i32_10 = arith.constant 15 : i32
    %21 = tpu.dynamic_rotate %18 by %c15_i32_10 dim 1 : vector<8x256xf32>, i32 -> vector<8x256xf32>
    %c1_i32_11 = arith.constant 1 : i32
    %22 = tpu.dynamic_rotate %18 by %c1_i32_11 dim 1 : vector<8x256xf32>, i32 -> vector<8x256xf32>
    %c255_i32_12 = arith.constant 255 : i32
    %23 = tpu.dynamic_rotate %18 by %c255_i32_12 dim 1 : vector<8x256xf32>, i32 -> vector<8x256xf32>
    %c241_i32_13 = arith.constant 241 : i32
    %24 = tpu.dynamic_rotate %18 by %c241_i32_13 dim 1 : vector<8x256xf32>, i32 -> vector<8x256xf32>
    %c240_i32_14 = arith.constant 240 : i32
    %25 = tpu.dynamic_rotate %18 by %c240_i32_14 dim 1 : vector<8x256xf32>, i32 -> vector<8x256xf32>
    %c239_i32_15 = arith.constant 239 : i32
    %26 = tpu.dynamic_rotate %18 by %c239_i32_15 dim 1 : vector<8x256xf32>, i32 -> vector<8x256xf32>
    %27 = tpu.concatenate %19, %20, %21, %22, %18, %23, %24, %25, %26 in 0 : vector<8x256xf32>, vector<8x256xf32>, vector<8x256xf32>, vector<8x256xf32>, vector<8x256xf32>, vector<8x256xf32>, vector<8x256xf32>, vector<8x256xf32>, vector<8x256xf32> -> vector<72x256xf32>
    %28 = arith.mulf %27, %2 : vector<72x256xf32>
    %c8 = arith.constant 8 : index
    %c0_16 = arith.constant 0 : index
    %29 = vector.load %arg2[%c8, %c0_16] : memref<24x72xf32, #tpu.memory_space<vmem>>, vector<8x72xf32>
    %c8_17 = arith.constant 8 : index
    %c0_18 = arith.constant 0 : index
    %30 = vector.load %arg3[%c8_17, %c0_18] : memref<24x1xf32, #tpu.memory_space<vmem>>, vector<8x1xf32>
    %cst_19 = arith.constant dense<0.000000e+00> : vector<8x256xf32>
    %31 = tpu.matmul %29, %28, %cst_19 {dimension_numbers = #tpu.dot_dimension_numbers<[1], [0], [0], [1], [0, 0, 1, 1], [], []>} : vector<8x72xf32>, vector<72x256xf32>, vector<8x256xf32> -> vector<8x256xf32>
    %32 = vector.broadcast %30 : vector<8x1xf32> to vector<8x256xf32>
    %33 = arith.addf %31, %32 : vector<8x256xf32>
    %34 = arith.addf %1, %33 : vector<8x256xf32>
    %c17_i32_20 = arith.constant 17 : i32
    %35 = tpu.dynamic_rotate %34 by %c17_i32_20 dim 1 : vector<8x256xf32>, i32 -> vector<8x256xf32>
    %c16_i32_21 = arith.constant 16 : i32
    %36 = tpu.dynamic_rotate %34 by %c16_i32_21 dim 1 : vector<8x256xf32>, i32 -> vector<8x256xf32>
    %c15_i32_22 = arith.constant 15 : i32
    %37 = tpu.dynamic_rotate %34 by %c15_i32_22 dim 1 : vector<8x256xf32>, i32 -> vector<8x256xf32>
    %c1_i32_23 = arith.constant 1 : i32
    %38 = tpu.dynamic_rotate %34 by %c1_i32_23 dim 1 : vector<8x256xf32>, i32 -> vector<8x256xf32>
    %c255_i32_24 = arith.constant 255 : i32
    %39 = tpu.dynamic_rotate %34 by %c255_i32_24 dim 1 : vector<8x256xf32>, i32 -> vector<8x256xf32>
    %c241_i32_25 = arith.constant 241 : i32
    %40 = tpu.dynamic_rotate %34 by %c241_i32_25 dim 1 : vector<8x256xf32>, i32 -> vector<8x256xf32>
    %c240_i32_26 = arith.constant 240 : i32
    %41 = tpu.dynamic_rotate %34 by %c240_i32_26 dim 1 : vector<8x256xf32>, i32 -> vector<8x256xf32>
    %c239_i32_27 = arith.constant 239 : i32
    %42 = tpu.dynamic_rotate %34 by %c239_i32_27 dim 1 : vector<8x256xf32>, i32 -> vector<8x256xf32>
    %43 = tpu.concatenate %35, %36, %37, %38, %34, %39, %40, %41, %42 in 0 : vector<8x256xf32>, vector<8x256xf32>, vector<8x256xf32>, vector<8x256xf32>, vector<8x256xf32>, vector<8x256xf32>, vector<8x256xf32>, vector<8x256xf32>, vector<8x256xf32> -> vector<72x256xf32>
    %44 = arith.mulf %43, %2 : vector<72x256xf32>
    %c16 = arith.constant 16 : index
    %c0_28 = arith.constant 0 : index
    %45 = vector.load %arg2[%c16, %c0_28] : memref<24x72xf32, #tpu.memory_space<vmem>>, vector<8x72xf32>
    %c16_29 = arith.constant 16 : index
    %c0_30 = arith.constant 0 : index
    %46 = vector.load %arg3[%c16_29, %c0_30] : memref<24x1xf32, #tpu.memory_space<vmem>>, vector<8x1xf32>
    %cst_31 = arith.constant dense<0.000000e+00> : vector<8x256xf32>
    %47 = tpu.matmul %45, %44, %cst_31 {dimension_numbers = #tpu.dot_dimension_numbers<[1], [0], [0], [1], [0, 0, 1, 1], [], []>} : vector<8x72xf32>, vector<72x256xf32>, vector<8x256xf32> -> vector<8x256xf32>
    %48 = vector.broadcast %46 : vector<8x1xf32> to vector<8x256xf32>
    %49 = arith.addf %47, %48 : vector<8x256xf32>
    %50 = arith.addf %33, %49 : vector<8x256xf32>
    %c0_32 = arith.constant 0 : index
    %c0_33 = arith.constant 0 : index
    %c0_34 = arith.constant 0 : index
    %51 = vector.load %arg5[%c0_32, %c0_33, %c0_34] : memref<1x8x256xf32, #tpu.memory_space<vmem>>, vector<1x8x256xf32>
    %52 = vector.shape_cast %51 : vector<1x8x256xf32> to vector<8x256xf32>
    %53 = vector.shape_cast %50 : vector<8x256xf32> to vector<1x8x256xf32>
    tpu.vector_store %arg5[%c0_32, %c0_33, %c0_34], %53 {strides = array<i32>} : memref<1x8x256xf32, #tpu.memory_space<vmem>>, vector<1x8x256xf32>,
    return
  }
  func.func @transform_0(%arg0: i32) -> (i32, i32, i32) {
    %c0_i32 = arith.constant 0 : i32
    %c0_i32_0 = arith.constant 0 : i32
    %c0_i32_1 = arith.constant 0 : i32
    return %arg0, %c0_i32, %c0_i32_0 : i32, i32, i32
  }
  func.func @transform_1(%arg0: i32) -> (i32, i32) {
    %c0_i32 = arith.constant 0 : i32
    %c0_i32_0 = arith.constant 0 : i32
    %c0_i32_1 = arith.constant 0 : i32
    return %c0_i32, %c0_i32_0 : i32, i32
  }
  func.func @transform_2(%arg0: i32) -> (i32, i32) {
    %c0_i32 = arith.constant 0 : i32
    %c0_i32_0 = arith.constant 0 : i32
    %c0_i32_1 = arith.constant 0 : i32
    return %c0_i32, %c0_i32_0 : i32, i32
  }
  func.func @transform_3(%arg0: i32) -> (i32, i32) {
    %c0_i32 = arith.constant 0 : i32
    %c0_i32_0 = arith.constant 0 : i32
    %c0_i32_1 = arith.constant 0 : i32
    return %c0_i32, %c0_i32_0 : i32, i32
  }
  func.func @transform_4(%arg0: i32) -> (i32, i32, i32) {
    %c0_i32 = arith.constant 0 : i32
    %c0_i32_0 = arith.constant 0 : i32
    %c0_i32_1 = arith.constant 0 : i32
    return %arg0, %c0_i32, %c0_i32_0 : i32, i32, i32
  }
}

</mosaic_0001>

<bundles_post_ra>
// kernel: model_forward.1
= control target key start
LH: loop header
LB: loop body
LE: loop exit
PB: predicated region body
PF: predicated region fallthrough
CT: control target
= control target key end

     0   :  { %s860_s15 = smov 0   ;;  %s1240_s0 = inlined_call_operand.vmem [shape: f32[2,8,256], index: 0, kind: input, shape index: {}]   ;;  %s1241_s1 = inlined_call_operand.vmem [shape: f32[24,72], index: 1, kind: input, shape index: {}]   ;;  %s1242_s2 = inlined_call_operand.vmem [shape: f32[24,1], index: 2, kind: input, shape index: {}]   ;;  %s1243_s3 = inlined_call_operand.vmem [shape: f32[72,256], index: 3, kind: input, shape index: {}]   ;;  %s1244_s4 = inlined_call_operand.vmem [shape: f32[2,8,256], index: 4, kind: output, shape index: {}]  }
   0x1 LB: > { %s733_s16 = sadd.s32 4294967295, %s823_s15   ;;  %p737_p0 = scmp.ge.s32.totalorder %s823_s15, 1  ;;  %s823_s15 = sphi %s860_s15, %s14_s15  }
   0x2   : > { %p162_p1 = scmp.lt.s32.totalorder %s823_s15, 3 }
   0x4   : > { %p163_p2 = pnand %p737_p0, %p162_p1 }
   0x5   : > { %p188_p3 = scmp.lt.s32.totalorder (!%p163_p2), %s733_s16, 1  ;;  %s825_s21 = smov (!%p163_p2), 16   ;;  %v831_v2 = vmov (!%p163_p2), 0.0   ;;  %v832_v3 = vmov (!%p163_p2), 0   ;;  %v295_v4 = vld [vmem:[%s1242_s2] sm:$0xff] (!%p163_p2)  ;;  %v222_v5 = vlaneseq (!%p163_p2)  ;;  %v922_v9 = vld [vmem:[%s1243_s3 + $0x10] sm:$0xff] (!%p163_p2) }
   0x6   : > { %166 = sbr.rel (%p163_p2) target bundleno = 1122 (0x462), region = 36  ;;  %s826_s22 = smov (!%p163_p2), 17   ;;  %369 = vmatprep.mubr.f32.mxu0 (!%p163_p2), %v831_v2  ;;  %518 = vmatprep.mubr.f32.mxu1 (!%p163_p2), %v831_v2  ;;  %v929_v10 = vld [vmem:[%s1243_s3] sm:$0xff] (!%p163_p2)  ;;  %v934_v11 = vld [vmem:[%s1243_s3 + $0x8] sm:$0xff] (!%p163_p2)  ;;  %v939_v12 = vld [vmem:[%s1243_s3 + $0x18] sm:$0xff] (!%p163_p2)  ;;  %vm301_vm8 = vcmask (!%p163_p2), 588800  }
   0x7   : > { %s827_s23 = smov (!%p163_p2), 15   ;;  %s828_s24 = smov (!%p163_p2), 1   ;;  %815 = vset.pattern.permute.xlu0 (!%p163_p2), %v832_v3  ;;  %816 = vset.pattern.permute.xlu1 (!%p163_p2), %v832_v3  ;;  %v917_v6 = vand.u32 (!%p163_p2), 127, %v222_v5  ;;  %v957_v27 = vld [vmem:[%s1243_s3 + $0x20] sm:$0xff] (!%p163_p2)  ;;  %v963_v28 = vld [vmem:[%s1243_s3 + $0x28] sm:$0xff] (!%p163_p2)  ;;  %v972_v31 = vld [vmem:[%s1243_s3 + $0x30] sm:$0xff] (!%p163_p2) }
   0x8   : > { %s829_s25 = smov (!%p163_p2), 127   ;;  %s830_s26 = smov (!%p163_p2), 113   ;;  %v977_v32 = vld [vmem:[%s1243_s3 + $0x38] sm:$0xff] (!%p163_p2)  ;;  %v987_v37 = vld [vmem:[%s1243_s3 + $0x48] sm:$0xff] (!%p163_p2)  ;;  %v992_v38 = vld [vmem:[%s1243_s3 + $0x40] sm:$0xff] (!%p163_p2) }
   0x9   : > { %s833_s27 = smov (!%p163_p2), 112   ;;  %s834_s28 = smov (!%p163_p2), 111   ;;  %vm231_vm0 = vcmp.lt.s32.totalorder (!%p163_p2), %v917_v6, 16  ;;  %vm224_vm1 = vcmp.lt.s32.totalorder (!%p163_p2), %v917_v6, 17  ;;  %vm238_vm2 = vcmp.lt.s32.totalorder (!%p163_p2), %v917_v6, 15  ;;  %vm245_vm3 = vcmp.lt.s32.totalorder (!%p163_p2), %v917_v6, 1 }
   0xa   : > { %vm252_vm4 = vcmp.lt.s32.totalorder (!%p163_p2), %v917_v6, 127  ;;  %v1001_v43 = vld [vmem:[%s1243_s3 + $0x50] sm:$0xff] (!%p163_p2)  ;;  %v1006_v44 = vld [vmem:[%s1243_s3 + $0x58] sm:$0xff] (!%p163_p2)  ;;  %vm259_vm5 = vcmp.lt.s32.totalorder (!%p163_p2), %v917_v6, 113  ;;  %v1022_v59 = vld [vmem:[%s1243_s3 + $0x60] sm:$0xff] (!%p163_p2)  ;;  %vm266_vm6 = vcmp.lt.s32.totalorder (!%p163_p2), %v917_v6, 112 }
   0xb   : > { %v1028_v60 = vld [vmem:[%s1243_s3 + $0x68] sm:$0xff] (!%p163_p2)  ;;  %v1037_v63 = vld [vmem:[%s1243_s3 + $0x70] sm:$0xff] (!%p163_p2)  ;;  %v1042_v3 = vld [vmem:[%s1243_s3 + $0x78] sm:$0xff] (!%p163_p2)  ;;  %vm273_vm7 = vcmp.lt.s32.totalorder (!%p163_p2), %v917_v6, 111 }
   0xd   : > { %s1246_s16 = smov (!%p188_p3, %s733_s16), 1 }
   0xe   : > { %s747_s17 = sshll.u32 %s1246_s16, 4 }
   0xf   : > { %s192_s20 = scalar_lea.vmem %s1240_s0, %s747_s17 }
  0x10   : > { %v876_v0 = vld [vmem:[%s192_s20] sm:$0xff]  ;;  %v882_v1 = vld [vmem:[%s192_s20 + $0x8] sm:$0xff] }
  0x11   : > { %227 = vrot.lane.b32.xlu1 %v876_v0, %s825_s21  ;;  %218 = vrot.lane.b32.xlu0 %v876_v0, %s826_s22  ;;  %v285_v49 = vmul.f32 %v987_v37, %v882_v1  ;;  %v284_v50 = vmul.f32 %v992_v38, %v876_v0 }
  0x15   : > { %229 = vrot.lane.b32.xlu1 %v882_v1, %s825_s21  ;;  %220 = vrot.lane.b32.xlu0 %v882_v1, %s826_s22 }
  0x19   : > { %236 = vrot.lane.b32.xlu1 %v882_v1, %s827_s23  ;;  %234 = vrot.lane.b32.xlu0 %v876_v0, %s827_s23 }
  0x1d   : > { %243 = vrot.lane.b32.xlu1 %v882_v1, %s828_s24  ;;  %241 = vrot.lane.b32.xlu0 %v876_v0, %s828_s24 }
  0x21   : > { %250 = vrot.lane.b32.xlu1 %v882_v1, %s829_s25  ;;  %248 = vrot.lane.b32.xlu0 %v876_v0, %s829_s25 }
  0x25   : > { %257 = vrot.lane.b32.xlu1 %v882_v1, %s830_s26  ;;  %255 = vrot.lane.b32.xlu0 %v876_v0, %s830_s26 }
  0x29   : > { %264 = vrot.lane.b32.xlu1 %v882_v1, %s833_s27  ;;  %262 = vrot.lane.b32.xlu0 %v876_v0, %s833_s27 }
  0x2d   : > { %271 = vrot.lane.b32.xlu1 %v882_v1, %s834_s28  ;;  %269 = vrot.lane.b32.xlu0 %v876_v0, %s834_s28 }
  0x31   : > { %298 = vperm.xlu0 %815, %v295_v4  }
  0x83   : > { %v228_v7 = vpop.permute.xlu1 %227  ;;  %v219_v8 = vpop.permute.xlu0 %218 }
  0x87   : > { %v230_v13 = vpop.permute.xlu1 %229  ;;  %v221_v14 = vpop.permute.xlu0 %220 }
  0x88   : > { %v232_v15 = vsel %vm231_vm0, %v228_v7, %v230_v13  ;;  %v233_v16 = vsel %vm231_vm0, %v230_v13, %v228_v7  ;;  %v225_v17 = vsel %vm224_vm1, %v219_v8, %v221_v14  ;;  %v226_v18 = vsel %vm224_vm1, %v221_v14, %v219_v8 }
  0x89   : > { %v278_v19 = vmul.f32 %v233_v16, %v922_v9  ;;  %v276_v20 = vmul.f32 %v226_v18, %v929_v10  ;;  %v277_v21 = vmul.f32 %v225_v17, %v934_v11  ;;  %v279_v22 = vmul.f32 %v232_v15, %v939_v12  ;;  %v1056_v17 = vld [vmem:[%s1243_s3 + $0x88] sm:$0xff] }
  0x8b   : > { %v237_v23 = vpop.permute.xlu1 %236  ;;  %v235_v24 = vpop.permute.xlu0 %234  ;;  %v749_v25 = vpack.c.bf16 %v279_v22, %v277_v21  ;;  %v751_v26 = vpack.c.bf16 %v278_v19, %v276_v20  ;;  %v1061_v19 = vld [vmem:[%s1243_s3 + $0x80] sm:$0xff] }
  0x8c   : > { %v239_v29 = vsel %vm238_vm2, %v235_v24, %v237_v23  ;;  %v240_v30 = vsel %vm238_vm2, %v237_v23, %v235_v24 }
  0x8d   : > { %750 = vmatprep.subr.bf16.mxu0 %v749_v25  ;;  %v280_v39 = vmul.f32 %v240_v30, %v957_v27  ;;  %v281_v40 = vmul.f32 %v239_v29, %v963_v28  ;;  %v294_v29 = vld [vmem:[%s1241_s1] sm:$0xff] }
  0x8e   : > { %752 = vmatpush1.bf16.msra.mxu0 %v751_v26 }
  0x8f   : > { %v244_v33 = vpop.permute.xlu1 %243  ;;  %v242_v34 = vpop.permute.xlu0 %241 }
  0x90   : > { %v246_v35 = vsel %vm245_vm3, %v242_v34, %v244_v33  ;;  %v247_v36 = vsel %vm245_vm3, %v244_v33, %v242_v34 }
  0x91   : > { %v282_v41 = vmul.f32 %v247_v36, %v972_v31  ;;  %v283_v42 = vmul.f32 %v246_v35, %v977_v32 }
  0x93   : > { %v251_v45 = vpop.permute.xlu1 %250  ;;  %v249_v46 = vpop.permute.xlu0 %248  ;;  %v753_v47 = vpack.c.bf16 %v283_v42, %v281_v40  ;;  %v755_v48 = vpack.c.bf16 %v282_v41, %v280_v39 }
  0x94   : > { %v253_v51 = vsel %vm252_vm4, %v249_v46, %v251_v45  ;;  %v254_v52 = vsel %vm252_vm4, %v251_v45, %v249_v46 }
  0x95   : > { %v286_v53 = vmul.f32 %v253_v51, %v1001_v43  ;;  %v287_v54 = vmul.f32 %v254_v52, %v1006_v44  ;;  %754 = vmatprep.subr.bf16.mxu0 %v753_v47 }
  0x96   : > { %756 = vmatpush1.bf16.msra.mxu0 %v755_v48 }
  0x97   : > { %v258_v55 = vpop.permute.xlu1 %257  ;;  %v256_v56 = vpop.permute.xlu0 %255  ;;  %v757_v57 = vpack.c.bf16 %v287_v54, %v285_v49  ;;  %v759_v58 = vpack.c.bf16 %v286_v53, %v284_v50 }
  0x98   : > { %v260_v61 = vsel %vm259_vm5, %v256_v56, %v258_v55  ;;  %v261_v62 = vsel %vm259_vm5, %v258_v55, %v256_v56 }
  0x99   : > { %758 = vmatprep.subr.bf16.mxu0 %v757_v57  ;;  %v288_v13 = vmul.f32 %v260_v61, %v1022_v59  ;;  %v289_v14 = vmul.f32 %v261_v62, %v1028_v60 }
  0x9a   : > { %760 = vmatpush1.bf16.msra.mxu0 %v759_v58 }
  0x9b   : > { %v265_v4 = vpop.permute.xlu1 %264  ;;  %v263_v5 = vpop.permute.xlu0 %262 }
  0x9c   : > { %v267_v7 = vsel %vm266_vm6, %v263_v5, %v265_v4  ;;  %v268_v8 = vsel %vm266_vm6, %v265_v4, %v263_v5 }
  0x9d   : > { %v290_v15 = vmul.f32 %v267_v7, %v1037_v63  ;;  %v291_v16 = vmul.f32 %v268_v8, %v1042_v3 }
  0x9f   : > { %v272_v18 = vpop.permute.xlu1 %271  ;;  %v270_v20 = vpop.permute.xlu0 %269  ;;  %v761_v21 = vpack.c.bf16 %v291_v16, %v289_v14  ;;  %v763_v22 = vpack.c.bf16 %v290_v15, %v288_v13 }
  0xa0   : > { %v274_v23 = vsel %vm273_vm7, %v270_v20, %v272_v18  ;;  %v275_v24 = vsel %vm273_vm7, %v272_v18, %v270_v20 }
  0xa1   : > { %v293_v25 = vmul.f32 %v275_v24, %v1056_v17  ;;  %762 = vmatprep.subr.bf16.mxu0 %v761_v21  ;;  %v292_v26 = vmul.f32 %v274_v23, %v1061_v19 }
  0xa2   : > { %764 = vmatpush1.bf16.msra.mxu0 %v763_v22 }
  0xa3   : > { %321 = vmatprep.subr.mxu0 %v293_v25 }
  0xa6   : > { %322 = vmatpush1.msra.mxu0 %v292_v26 }
  0xa7   : > { %742 = vmatmul.mubr.msk.f32.vlgmr.msra.gmra.mrb[0].mxu0 %vm301_vm8, %v294_v29 }
  0xa8   : > { %667 = vmatprep.mubr.f32.mxu0 %v831_v2  ;;  %v445_v2 = vld [vmem:[%s1242_s2 + $0x8] sm:$0xff] }
  0xb0   : > { %v299_v30 = vpop.permute.xlu0 %298 }
 0x17a   : > { %v371_v33 = vpop.f32.mrb[0].mxu0 }
 0x17b   : > { %v372_v34 = vadd.f32 %v371_v33, %v299_v30  ;;  %v373_v35 = vpop.f32.mrb[1].mxu0 }
 0x17c   : > { %v374_v39 = vadd.f32 %v373_v35, %v299_v30 }
 0x17d   : > { %v376_v36 = vadd.f32 %v372_v34, %v876_v0 }
 0x17e   : > { %v377_v40 = vadd.f32 %v374_v39, %v882_v1 }
 0x17f   : > { %384 = vrot.lane.b32.xlu0 %v376_v36, %s825_s21  ;;  %378 = vrot.lane.b32.xlu1 %v376_v36, %s826_s22  ;;  %v434_v33 = vmul.f32 %v376_v36, %v992_v38 }
 0x180   : > { %v435_v30 = vmul.f32 %v377_v40, %v987_v37 }
 0x183   : > { %390 = vrot.lane.b32.xlu0 %v376_v36, %s827_s23  ;;  %380 = vrot.lane.b32.xlu1 %v377_v40, %s826_s22 }
 0x187   : > { %396 = vrot.lane.b32.xlu0 %v376_v36, %s828_s24  ;;  %386 = vrot.lane.b32.xlu1 %v377_v40, %s825_s21 }
 0x18b   : > { %402 = vrot.lane.b32.xlu0 %v376_v36, %s829_s25  ;;  %392 = vrot.lane.b32.xlu1 %v377_v40, %s827_s23 }
 0x18f   : > { %408 = vrot.lane.b32.xlu0 %v376_v36, %s830_s26  ;;  %398 = vrot.lane.b32.xlu1 %v377_v40, %s828_s24 }
 0x193   : > { %414 = vrot.lane.b32.xlu0 %v376_v36, %s833_s27  ;;  %404 = vrot.lane.b32.xlu1 %v377_v40, %s829_s25 }
 0x197   : > { %420 = vrot.lane.b32.xlu0 %v376_v36, %s834_s28  ;;  %410 = vrot.lane.b32.xlu1 %v377_v40, %s830_s26 }
 0x19b   : > { %448 = vperm.xlu0 %815, %v445_v2   ;;  %416 = vrot.lane.b32.xlu1 %v377_v40, %s833_s27 }
 0x19f   : > { %422 = vrot.lane.b32.xlu1 %v377_v40, %s834_s28 }
 0x1f1   : > { %v385_v41 = vpop.permute.xlu0 %384  ;;  %v379_v42 = vpop.permute.xlu1 %378 }
 0x1f5   : > { %v391_v45 = vpop.permute.xlu0 %390  ;;  %v381_v46 = vpop.permute.xlu1 %380 }
 0x1f6   : > { %v382_v47 = vsel %vm224_vm1, %v379_v42, %v381_v46  ;;  %v383_v48 = vsel %vm224_vm1, %v381_v46, %v379_v42 }
 0x1f7   : > { %v426_v53 = vmul.f32 %v383_v48, %v929_v10  ;;  %v427_v55 = vmul.f32 %v382_v47, %v934_v11 }
 0x1f9   : > { %v397_v49 = vpop.permute.xlu0 %396  ;;  %v387_v50 = vpop.permute.xlu1 %386 }
 0x1fa   : > { %v388_v51 = vsel %vm231_vm0, %v385_v41, %v387_v50  ;;  %v389_v52 = vsel %vm231_vm0, %v387_v50, %v385_v41 }
 0x1fb   : > { %v428_v54 = vmul.f32 %v389_v52, %v922_v9  ;;  %v429_v56 = vmul.f32 %v388_v51, %v939_v12 }
 0x1fd   : > { %v393_v57 = vpop.permute.xlu1 %392  ;;  %v765_v58 = vpack.c.bf16 %v429_v56, %v427_v55  ;;  %v767_v61 = vpack.c.bf16 %v428_v54, %v426_v53  ;;  %v403_v62 = vpop.permute.xlu0 %402 }
 0x1fe   : > { %v394_v4 = vsel %vm238_vm2, %v391_v45, %v393_v57  ;;  %v395_v5 = vsel %vm238_vm2, %v393_v57, %v391_v45 }
 0x1ff   : > { %766 = vmatprep.subr.bf16.mxu1 %v765_v58  ;;  %v430_v14 = vmul.f32 %v395_v5, %v957_v27  ;;  %v431_v15 = vmul.f32 %v394_v4, %v963_v28  ;;  %v444_v58 = vld [vmem:[%s1241_s1 + $0x8] sm:$0xff] }
 0x200   : > { %768 = vmatpush1.bf16.msra.mxu1 %v767_v61 }
 0x201   : > { %v399_v7 = vpop.permute.xlu1 %398  ;;  %v409_v20 = vpop.permute.xlu0 %408 }
 0x202   : > { %v400_v8 = vsel %vm245_vm3, %v397_v49, %v399_v7  ;;  %v401_v13 = vsel %vm245_vm3, %v399_v7, %v397_v49 }
 0x203   : > { %v432_v16 = vmul.f32 %v401_v13, %v972_v31  ;;  %v433_v18 = vmul.f32 %v400_v8, %v977_v32 }
 0x205   : > { %v405_v21 = vpop.permute.xlu1 %404  ;;  %v769_v22 = vpack.c.bf16 %v433_v18, %v431_v15  ;;  %v771_v23 = vpack.c.bf16 %v432_v16, %v430_v14  ;;  %v415_v2 = vpop.permute.xlu0 %414 }
 0x206   : > { %v406_v24 = vsel %vm252_vm4, %v403_v62, %v405_v21  ;;  %v407_v25 = vsel %vm252_vm4, %v405_v21, %v403_v62 }
 0x207   : > { %v436_v26 = vmul.f32 %v406_v24, %v1001_v43  ;;  %v437_v29 = vmul.f32 %v407_v25, %v1006_v44  ;;  %770 = vmatprep.subr.bf16.mxu1 %v769_v22 }
 0x208   : > { %772 = vmatpush1.bf16.msra.mxu1 %v771_v23 }
 0x209   : > { %v411_v34 = vpop.permute.xlu1 %410  ;;  %v773_v35 = vpack.c.bf16 %v437_v29, %v435_v30  ;;  %v775_v39 = vpack.c.bf16 %v436_v26, %v434_v33  ;;  %v421_v50 = vpop.permute.xlu0 %420 }
 0x20a   : > { %v412_v41 = vsel %vm259_vm5, %v409_v20, %v411_v34  ;;  %v413_v42 = vsel %vm259_vm5, %v411_v34, %v409_v20 }
 0x20b   : > { %774 = vmatprep.subr.bf16.mxu1 %v773_v35  ;;  %v438_v40 = vmul.f32 %v412_v41, %v1022_v59  ;;  %v439_v47 = vmul.f32 %v413_v42, %v1028_v60 }
 0x20c   : > { %776 = vmatpush1.bf16.msra.mxu1 %v775_v39 }
 0x20d   : > { %v417_v45 = vpop.permute.xlu1 %416 }
 0x20e   : > { %v418_v46 = vsel %vm266_vm6, %v415_v2, %v417_v45  ;;  %v419_v36 = vsel %vm266_vm6, %v417_v45, %v415_v2 }
 0x20f   : > { %v440_v48 = vmul.f32 %v418_v46, %v1037_v63  ;;  %v441_v49 = vmul.f32 %v419_v36, %v1042_v3 }
 0x211   : > { %v423_v51 = vpop.permute.xlu1 %422  ;;  %v777_v52 = vpack.c.bf16 %v441_v49, %v439_v47  ;;  %v779_v53 = vpack.c.bf16 %v440_v48, %v438_v40 }
 0x212   : > { %v425_v54 = vsel %vm273_vm7, %v423_v51, %v421_v50  ;;  %v424_v55 = vsel %vm273_vm7, %v421_v50, %v423_v51 }
 0x213   : > { %v443_v56 = vmul.f32 %v425_v54, %v1056_v17  ;;  %778 = vmatprep.subr.bf16.mxu1 %v777_v52  ;;  %v442_v57 = vmul.f32 %v424_v55, %v1061_v19 }
 0x214   : > { %780 = vmatpush1.bf16.msra.mxu1 %v779_v53 }
 0x215   : > { %470 = vmatprep.subr.mxu1 %v443_v56 }
 0x218   : > { %471 = vmatpush1.msra.mxu1 %v442_v57 }
 0x219   : > { %743 = vmatmul.mubr.msk.f32.vlgmr.msra.gmra.mrb[0].mxu1 %vm301_vm8, %v444_v58 }
 0x21a   : > { %v449_v61 = vpop.permute.xlu0 %448 }
 0x2ec   : > { %v520_v62 = vpop.f32.mrb[0].mxu1 }
 0x2ed   : > { %v1149_v4 = vadd.f32 %v520_v62, %v449_v61  ;;  %v522_v5 = vpop.f32.mrb[1].mxu1 }
 0x2ee   : > { %v1151_v7 = vadd.f32 %v522_v5, %v449_v61 }
 0x2ef   : > { %v525_v8 = vadd.f32 %v1149_v4, %v876_v0  ;;  %v594_v0 = vld [vmem:[%s1242_s2 + $0x10] sm:$0xff] }
 0x2f0   : > { %v526_v13 = vadd.f32 %v1151_v7, %v882_v1 }
 0x2f1   : > { %527 = vrot.lane.b32.xlu1 %v525_v8, %s826_s22  ;;  %v583_v50 = vmul.f32 %v525_v8, %v992_v38 }
 0x2f2   : > { %529 = vrot.lane.b32.xlu0 %v526_v13, %s826_s22 }
 0x2f5   : > { %533 = vrot.lane.b32.xlu1 %v525_v8, %s825_s21 }
 0x2f6   : > { %535 = vrot.lane.b32.xlu0 %v526_v13, %s825_s21 }
 0x2f9   : > { %539 = vrot.lane.b32.xlu1 %v525_v8, %s827_s23 }
 0x2fa   : > { %541 = vrot.lane.b32.xlu0 %v526_v13, %s827_s23 }
 0x2fd   : > { %545 = vrot.lane.b32.xlu1 %v525_v8, %s828_s24 }
 0x2fe   : > { %547 = vrot.lane.b32.xlu0 %v526_v13, %s828_s24 }
 0x301   : > { %551 = vrot.lane.b32.xlu1 %v525_v8, %s829_s25 }
 0x302   : > { %553 = vrot.lane.b32.xlu0 %v526_v13, %s829_s25 }
 0x305   : > { %557 = vrot.lane.b32.xlu1 %v525_v8, %s830_s26 }
 0x306   : > { %559 = vrot.lane.b32.xlu0 %v526_v13, %s830_s26 }
 0x309   : > { %563 = vrot.lane.b32.xlu1 %v525_v8, %s833_s27 }
 0x30a   : > { %565 = vrot.lane.b32.xlu0 %v526_v13, %s833_s27  ;;  %s197_s27 = scalar_lea.vmem %s1244_s4, %s747_s17 }
 0x30d   : > { %569 = vrot.lane.b32.xlu1 %v525_v8, %s834_s28 }
 0x30e   : > { %571 = vrot.lane.b32.xlu0 %v526_v13, %s834_s28 }
 0x311   : > { %597 = vperm.xlu1 %816, %v594_v0  }
 0x363   : > { %v528_v1 = vpop.permute.xlu1 %527 }
 0x364   : > { %v530_v14 = vpop.permute.xlu0 %529 }
 0x365   : > { %v531_v15 = vsel %vm224_vm1, %v528_v1, %v530_v14  ;;  %v532_v16 = vsel %vm224_vm1, %v530_v14, %v528_v1 }
 0x366   : > { %v575_v23 = vmul.f32 %v532_v16, %v929_v10  ;;  %v576_v24 = vmul.f32 %v531_v15, %v934_v11 }
 0x367   : > { %v534_v18 = vpop.permute.xlu1 %533 }
 0x368   : > { %v536_v20 = vpop.permute.xlu0 %535 }
 0x369   : > { %v537_v21 = vsel %vm231_vm0, %v534_v18, %v536_v20  ;;  %v538_v22 = vsel %vm231_vm0, %v536_v20, %v534_v18 }
 0x36a   : > { %v577_v25 = vmul.f32 %v538_v22, %v922_v9  ;;  %v578_v26 = vmul.f32 %v537_v21, %v939_v12 }
 0x36b   : > { %v540_v29 = vpop.permute.xlu1 %539 }
 0x36c   : > { %v783_v30 = vpack.c.bf16 %v577_v25, %v575_v23  ;;  %v542_v33 = vpop.permute.xlu0 %541  ;;  %v781_v34 = vpack.c.bf16 %v578_v26, %v576_v24 }
 0x36d   : > { %v543_v35 = vsel %vm238_vm2, %v540_v29, %v542_v33  ;;  %v544_v39 = vsel %vm238_vm2, %v542_v33, %v540_v29 }
 0x36e   : > { %782 = vmatprep.subr.bf16.mxu0 %v781_v34  ;;  %v579_v12 = vmul.f32 %v544_v39, %v957_v27  ;;  %v580_v41 = vmul.f32 %v543_v35, %v963_v28 }
 0x36f   : > { %784 = vmatpush1.bf16.msra.mxu0 %v783_v30  ;;  %v546_v2 = vpop.permute.xlu1 %545 }
 0x370   : > { %v548_v10 = vpop.permute.xlu0 %547 }
 0x371   : > { %v549_v11 = vsel %vm245_vm3, %v546_v2, %v548_v10  ;;  %v550_v9 = vsel %vm245_vm3, %v548_v10, %v546_v2 }
 0x372   : > { %v581_v42 = vmul.f32 %v550_v9, %v972_v31  ;;  %v582_v45 = vmul.f32 %v549_v11, %v977_v32  ;;  %v584_v31 = vmul.f32 %v526_v13, %v987_v37 }
 0x373   : > { %v552_v46 = vpop.permute.xlu1 %551 }
 0x374   : > { %v787_v36 = vpack.c.bf16 %v581_v42, %v579_v12  ;;  %v554_v40 = vpop.permute.xlu0 %553  ;;  %v785_v47 = vpack.c.bf16 %v582_v45, %v580_v41 }
 0x375   : > { %v555_v48 = vsel %vm252_vm4, %v552_v46, %v554_v40  ;;  %v556_v49 = vsel %vm252_vm4, %v554_v40, %v552_v46 }
 0x376   : > { %v585_v27 = vmul.f32 %v555_v48, %v1001_v43  ;;  %v586_v28 = vmul.f32 %v556_v49, %v1006_v44  ;;  %786 = vmatprep.subr.bf16.mxu0 %v785_v47 }
 0x377   : > { %788 = vmatpush1.bf16.msra.mxu0 %v787_v36  ;;  %v558_v32 = vpop.permute.xlu1 %557 }
 0x378   : > { %v791_v51 = vpack.c.bf16 %v585_v27, %v583_v50  ;;  %v560_v52 = vpop.permute.xlu0 %559  ;;  %v789_v53 = vpack.c.bf16 %v586_v28, %v584_v31 }
 0x379   : > { %v561_v54 = vsel %vm259_vm5, %v558_v32, %v560_v52  ;;  %v562_v55 = vsel %vm259_vm5, %v560_v52, %v558_v32 }
 0x37a   : > { %790 = vmatprep.subr.bf16.mxu0 %v789_v53  ;;  %v587_v56 = vmul.f32 %v561_v54, %v1022_v59  ;;  %v588_v57 = vmul.f32 %v562_v55, %v1028_v60  ;;  %v593_v60 = vld [vmem:[%s1241_s1 + $0x10] sm:$0xff] }
 0x37b   : > { %v564_v38 = vpop.permute.xlu1 %563  ;;  %792 = vmatpush1.bf16.msra.mxu0 %v791_v51 }
 0x37c   : > { %v566_v43 = vpop.permute.xlu0 %565 }
 0x37d   : > { %v567_v44 = vsel %vm266_vm6, %v564_v38, %v566_v43  ;;  %v568_v37 = vsel %vm266_vm6, %v566_v43, %v564_v38 }
 0x37e   : > { %v589_v58 = vmul.f32 %v567_v44, %v1037_v63  ;;  %v590_v61 = vmul.f32 %v568_v37, %v1042_v3 }
 0x37f   : > { %v570_v62 = vpop.permute.xlu1 %569 }
 0x380   : > { %v795_v5 = vpack.c.bf16 %v589_v58, %v587_v56  ;;  %v572_v8 = vpop.permute.xlu0 %571  ;;  %v793_v13 = vpack.c.bf16 %v590_v61, %v588_v57 }
 0x381   : > { %v574_v0 = vsel %vm273_vm7, %v572_v8, %v570_v62  ;;  %v573_v1 = vsel %vm273_vm7, %v570_v62, %v572_v8 }
 0x382   : > { %v592_v14 = vmul.f32 %v574_v0, %v1056_v17  ;;  %794 = vmatprep.subr.bf16.mxu0 %v793_v13  ;;  %v591_v59 = vmul.f32 %v573_v1, %v1061_v19 }
 0x383   : > { %796 = vmatpush1.bf16.msra.mxu0 %v795_v5 }
 0x384   : > { %619 = vmatprep.subr.mxu0 %v592_v14 }
 0x387   : > { %620 = vmatpush1.msra.mxu0 %v591_v59 }
 0x388   : > { %744 = vmatmul.mubr.msk.f32.vlgmr.msra.gmra.mrb[2].mxu0 %vm301_vm8, %v593_v60 }
 0x390   : > { %v598_v63 = vpop.permute.xlu1 %597 }
 0x45b   : > { %v669_v3 = vpop.f32.mrb[2].mxu0 }
 0x45c   : > { %v670_v15 = vadd.f32 %v669_v3, %v598_v63  ;;  %v671_v16 = vpop.f32.mrb[3].mxu0 }
 0x45d   : > { %v672_v6 = vadd.f32 %v671_v16, %v598_v63 }
 0x45e   : > { %v674_v17 = vadd.f32 %v670_v15, %v1149_v4 }
 0x45f   : > { %v675_v19 = vadd.f32 %v672_v6, %v1151_v7 }
 0x460   : > { %676 = vst [vmem:[%s197_s27] sm:$0xff] %v674_v17 }
 0x461   : > { %677 = vst [vmem:[%s197_s27 + $0x8] sm:$0xff] %v675_v19 }
 0x462 PF: > { %s14_s15 = sadd.s32 1, %s823_s15  }
 0x463   : > { %p11_p4 = scmp.ge.s32.totalorder %s14_s15, 4  }
 0x465   :  { %13 = sbr.rel (!%p11_p4) target bundleno = 1 (0x1), region = 66 }

</bundles_post_ra>
